<compile_context>
chip_gen: v7x
topology: tpu7x:2x2x1
jax: 0.10.0
libtpu: 0.0.40
codegen_flags: <defaults>
</compile_context>

<pallas_src>
import functools

import jax
import jax.numpy as jnp
from jax.experimental import pallas as pl
from jax.experimental.pallas import tpu as pltpu


def _residual_kernel(seed_ref, x_ref, w_ref, b_ref, gamma_ref, beta_ref, o_ref,
                     *, eps, dropout_p, training, use_eup_recip):
    x = x_ref[...].astype(jnp.float32)                      # [TILE_M, D]
    d = x.shape[-1]

    # --- LayerNormalization (torch semantics: unbiased std, eps added to std) ---
    # Fused single-pass statistics: one reduction sweep instead of two.
    s1 = jnp.sum(x, axis=-1, keepdims=True)                  # [TILE_M, 1]
    s2 = jnp.sum(x * x, axis=-1, keepdims=True)              # [TILE_M, 1]
    mean = s1 * (1.0 / d)
    var_unbiased = (s2 - d * mean * mean) * (1.0 / (d - 1))
    var_unbiased = jnp.maximum(var_unbiased, 0.0)            # guard cancellation
    denom = jnp.sqrt(var_unbiased) + eps
    if use_eup_recip:
        # EUP reciprocal (frees VPU slots) + one Newton step for near-exact result.
        inv = pl.reciprocal(denom, approx=True)
        inv = inv * (2.0 - denom * inv)
    else:
        inv = 1.0 / denom                                    # interpret-mode fallback
    gamma = gamma_ref[0]                                     # scalars from SMEM
    beta = beta_ref[0]
    normed = gamma * ((x - mean) * inv) + beta               # [TILE_M, D], f32

    # --- sublayer: dense projection on the MXU, bf16 inputs, f32 accumulate ---
    y = jnp.dot(normed.astype(jnp.bfloat16), w_ref[...],
                preferred_element_type=jnp.float32)
    y = y + b_ref[...].astype(jnp.float32)

    # --- dropout (inverted); identity in eval mode ---
    if training and dropout_p > 0.0:
        # Per-tile seed so different row tiles get different masks.
        pltpu.prng_seed(seed_ref[0] + pl.program_id(0))
        bits = pltpu.prng_random_bits(y.shape)
        if bits.dtype != jnp.uint32:
            bits = pltpu.bitcast(bits, jnp.uint32)
        # Integer-threshold compare: keep with probability (1 - p).
        thresh = jnp.uint32(min(int(round(dropout_p * 2.0 ** 32)), 2 ** 32 - 1))
        keep = bits >= thresh
        y = jnp.where(keep, y * (1.0 / (1.0 - dropout_p)), 0.0)

    # --- residual add: re-read x from VMEM (free) instead of keeping the f32
    # copy live across the matmul / dropout (shorter live range, less spill).
    o_ref[...] = (x_ref[...].astype(jnp.float32) + y).astype(o_ref.dtype)


def _vmem_budget_bytes():
    """Physical VMEM of the current chip minus ~25% headroom for compiler scratch."""
    try:
        phys = int(pltpu.get_tpu_info().vmem_capacity_bytes)
    except Exception:
        phys = 64 * 1024 * 1024          # most conservative (v7x per-TensorCore)
    return (phys * 3) // 4               # ~48 MiB on v7x, ~96 MiB on v5e/v6e


def _pick_tile_m(n_rows, d, x_bytes, out_bytes, w_bytes, vmem_budget):
    """D-aware row-tile size: biggest tile that fits the VMEM budget, capped at 1024."""
    # 2 pipelined buffers each for the x tile and the out tile, plus ~3 f32
    # [tile_m, D] intermediates (normed / matmul result / dropout math).
    per_row = d * (2 * x_bytes + 2 * out_bytes + 3 * 4)
    avail = vmem_budget - w_bytes - (2 << 20)     # W (single-buffered) + margin
    tile = max(8, avail // per_row) if avail > per_row * 8 else 8
    return int(min(1024, tile, n_rows))


def residual_connection(x, w, b, gamma, beta, *, dropout_p, eps=1e-6,
                        training=False, seed=0, tile_m=None):
    """x: [B, S, D].  Returns x + dropout(LayerNorm(x) @ w + b).

    Output dtype follows x (pass bf16 activations for halved HBM traffic).
    For production shapes D should be a multiple of 128 (lane-aligned) so
    stores are unmasked and the MXU/VPU lanes are fully used.
    """
    B, S, D = x.shape
    n_rows = B * S
    x2 = x.reshape(n_rows, D)
    w_bf16 = w.astype(jnp.bfloat16)                 # halves VMEM/HBM traffic for W
    b2 = b.reshape(1, D).astype(jnp.float32)
    gamma1 = gamma.reshape(1).astype(jnp.float32)
    beta1 = beta.reshape(1).astype(jnp.float32)
    seed_arr = jnp.asarray([seed], dtype=jnp.int32)

    x_bytes = jnp.dtype(x.dtype).itemsize
    out_bytes = x_bytes
    w_bytes = D * D * 2                              # bf16, single buffer
    vmem_budget = _vmem_budget_bytes()

    if tile_m is None:
        tile_m = _pick_tile_m(n_rows, D, x_bytes, out_bytes, w_bytes, vmem_budget)
    tile_m = min(int(tile_m), n_rows)

    # Sublane-alignment multiple: 8 for 4-byte activations, 16 for 2-byte (bf16).
    mult = 16 if x_bytes == 2 else 8
    if tile_m < n_rows:
        tile_m = max(mult, (tile_m // mult) * mult)
    # Keep at least two row tiles where possible so the "parallel" grid axis
    # actually splits work across v7x's two TensorCores (no-op on v5e/v6e).
    if tile_m >= n_rows and n_rows >= 2 * mult:
        tile_m = max(mult, ((n_rows // 2) // mult) * mult)
    grid_m = pl.cdiv(n_rows, tile_m)

    # pl.reciprocal(approx=True) and the stateful PRNG only lower on real TPUs.
    use_eup_recip = (jax.default_backend() == "tpu")

    kernel = functools.partial(_residual_kernel, eps=float(eps),
                               dropout_p=float(dropout_p),
                               training=bool(training),
                               use_eup_recip=use_eup_recip)

    out = pl.pallas_call(
        kernel,
        out_shape=jax.ShapeDtypeStruct((n_rows, D), x.dtype),
        grid_spec=pltpu.PrefetchScalarGridSpec(
            num_scalar_prefetch=1,          # dropout seed lands in SMEM
            grid=(grid_m,),
            in_specs=[
                # x tile: pipelined (default double-buffer).
                pl.BlockSpec((tile_m, D), lambda i, seed: (i, 0)),
                # W / bias: constant index_map -> fetched once; single buffer
                # halves their VMEM footprint.
                pl.BlockSpec((D, D), lambda i, seed: (0, 0),
                             pipeline_mode=pl.Buffered(1)),
                pl.BlockSpec((1, D), lambda i, seed: (0, 0),
                             pipeline_mode=pl.Buffered(1)),
                pl.BlockSpec(memory_space=pltpu.MemorySpace.SMEM),   # gamma (scalar)
                pl.BlockSpec(memory_space=pltpu.MemorySpace.SMEM),   # beta (scalar)
            ],
            out_specs=pl.BlockSpec((tile_m, D), lambda i, seed: (i, 0)),
        ),
        compiler_params=pltpu.CompilerParams(
            dimension_semantics=("parallel",),      # row tiles split across TCs (v7x)
            vmem_limit_bytes=int(vmem_budget)),
    )(seed_arr, x2, w_bf16, b2, gamma1, beta1)
    return out.reshape(B, S, D)


def _reference(x, w, b, gamma, beta, eps=1e-6):
    xf = x.astype(jnp.float32)
    d = xf.shape[-1]
    mean = jnp.mean(xf, axis=-1, keepdims=True)
    diff = xf - mean
    std = jnp.sqrt(jnp.sum(diff * diff, axis=-1, keepdims=True) / (d - 1))
    normed = gamma[0] * diff / (std + eps) + beta[0]
    # Mirror the kernel's MXU precision: bf16 inputs, f32 accumulation.
    y = jnp.dot(normed.astype(jnp.bfloat16), w.astype(jnp.bfloat16),
                preferred_element_type=jnp.float32) + b.astype(jnp.float32)
    return (xf + y).astype(x.dtype)


if __name__ == "__main__":
    key = jax.random.PRNGKey(0)
    B, S, D = 2, 8, 128          # D lane-aligned to 128 for unmasked stores
    kx, kw, kb = jax.random.split(key, 3)

    x = jax.random.normal(kx, (B, S, D), dtype=jnp.float32)
    # Deterministic "sublayer" (dense) parameters.
    w = jax.random.normal(kw, (D, D), dtype=jnp.float32) * (1.0 / jnp.sqrt(D))
    b = jax.random.normal(kb, (D,), dtype=jnp.float32) * 0.01
    # LayerNormalization parameters as in __init__: ones(1), zeros(1).
    gamma = jnp.ones((1,), dtype=jnp.float32)
    beta = jnp.zeros((1,), dtype=jnp.float32)

    # Eval mode (dropout = identity), matching PyTorch inference semantics.
    # Default tile_m -> 8 here (grid of 2 row tiles), exercising the tiled path.
    out = residual_connection(x, w, b, gamma, beta, dropout_p=0.1, training=False)
    out = jax.block_until_ready(out)

    ref = _reference(x, w, b, gamma, beta)
    assert out.shape == (B, S, D)
    # Tolerance covers bf16 MXU inputs on TPU.
    assert jnp.allclose(out, ref, atol=2e-2, rtol=2e-2), "mismatch vs reference"

    # Training path (stochastic dropout) uses the on-chip PRNG, which only
    # lowers on real TPU hardware (no CPU/interpret rule for prng_seed).
    if jax.default_backend() == "tpu":
        out_train = jax.block_until_ready(
            residual_connection(x, w, b, gamma, beta, dropout_p=0.1,
                                training=True, seed=1234))
        assert out_train.shape == (B, S, D)
        assert bool(jnp.all(jnp.isfinite(out_train)))

        # bf16 activation I/O path (halved HBM traffic; LN math stays f32).
        out_bf16 = jax.block_until_ready(
            residual_connection(x.astype(jnp.bfloat16), w, b, gamma, beta,
                                dropout_p=0.1, training=False))
        assert out_bf16.shape == (B, S, D) and out_bf16.dtype == jnp.bfloat16
        assert bool(jnp.all(jnp.isfinite(out_bf16.astype(jnp.float32))))

    print("KERNEL_OK")
</pallas_src>

<mosaic_0001>
module attributes {stable_mosaic.version = 11 : i64} {
  func.func @_residual_kernel(%arg0: i32, %arg1: memref<1xi32, #tpu.memory_space<smem>>, %arg2: memref<8x128xf32, #tpu.memory_space<vmem>>, %arg3: memref<128x128xbf16, #tpu.memory_space<vmem>>, %arg4: memref<1x128xf32, #tpu.memory_space<vmem>>, %arg5: memref<1xf32, #tpu.memory_space<smem>>, %arg6: memref<1xf32, #tpu.memory_space<smem>>, %arg7: memref<8x128xf32, #tpu.memory_space<vmem>>) attributes {dimension_semantics = [#tpu.dimension_semantics<parallel>], iteration_bounds = array<i64: 2>, scalar_prefetch = 1 : i64, scratch_operands = 0 : i64, tpu.core_type = #tpu.core_type<tc>, window_params = [{transform_indices = @transform_0, window_bounds = array<i64: 8, 128>}, {pipeline_mode = #tpu.pipeline_mode<synchronous>, transform_indices = @transform_1, window_bounds = array<i64: 128, 128>}, {pipeline_mode = #tpu.pipeline_mode<synchronous>, transform_indices = @transform_2, window_bounds = array<i64: 1, 128>}, {transform_indices = @transform_3, window_bounds = array<i64: 1>}, {transform_indices = @transform_4, window_bounds = array<i64: 1>}, {transform_indices = @transform_5, window_bounds = array<i64: 8, 128>}]} {
    %c0 = arith.constant 0 : index
    %c0_0 = arith.constant 0 : index
    %0 = vector.load %arg2[%c0, %c0_0] : memref<8x128xf32, #tpu.memory_space<vmem>>, vector<8x128xf32>
    %cst = arith.constant dense<0.000000e+00> : vector<8xf32>
    %1 = vector.multi_reduction <add>, %0, %cst [1] : vector<8x128xf32> to vector<8xf32>
    %2 = vector.shape_cast %1 : vector<8xf32> to vector<8x1xf32>
    %3 = arith.mulf %0, %0 : vector<8x128xf32>
    %cst_1 = arith.constant dense<0.000000e+00> : vector<8xf32>
    %4 = vector.multi_reduction <add>, %3, %cst_1 [1] : vector<8x128xf32> to vector<8xf32>
    %5 = vector.shape_cast %4 : vector<8xf32> to vector<8x1xf32>
    %cst_2 = arith.constant 7.812500e-03 : f32
    %6 = vector.broadcast %cst_2 : f32 to vector<8x1xf32>
    %7 = arith.mulf %2, %6 : vector<8x1xf32>
    %cst_3 = arith.constant 1.280000e+02 : f32
    %8 = vector.broadcast %cst_3 : f32 to vector<8x1xf32>
    %9 = arith.mulf %8, %7 : vector<8x1xf32>
    %10 = arith.mulf %9, %7 : vector<8x1xf32>
    %11 = arith.subf %5, %10 : vector<8x1xf32>
    %cst_4 = arith.constant 0.00787401571 : f32
    %12 = vector.broadcast %cst_4 : f32 to vector<8x1xf32>
    %13 = arith.mulf %11, %12 : vector<8x1xf32>
    %cst_5 = arith.constant 0.000000e+00 : f32
    %14 = vector.broadcast %cst_5 : f32 to vector<8x1xf32>
    %15 = arith.maximumf %13, %14 : vector<8x1xf32>
    %16 = math.sqrt %15 : vector<8x1xf32>
    %cst_6 = arith.constant 9.99999997E-7 : f32
    %17 = vector.broadcast %cst_6 : f32 to vector<8x1xf32>
    %18 = arith.addf %16, %17 : vector<8x1xf32>
    %cst_7 = arith.constant 1.000000e+00 : f32
    %19 = vector.broadcast %cst_7 : f32 to vector<8x1xf32>
    %20 = arith.divf %19, %18 : vector<8x1xf32>
    %c0_8 = arith.constant 0 : index
    %21 = memref.load %arg5[%c0_8] : memref<1xf32, #tpu.memory_space<smem>>
    %c0_9 = arith.constant 0 : index
    %22 = memref.load %arg6[%c0_9] : memref<1xf32, #tpu.memory_space<smem>>
    %23 = vector.broadcast %7 : vector<8x1xf32> to vector<8x128xf32>
    %24 = arith.subf %0, %23 : vector<8x128xf32>
    %25 = vector.broadcast %20 : vector<8x1xf32> to vector<8x128xf32>
    %26 = arith.mulf %24, %25 : vector<8x128xf32>
    %27 = vector.broadcast %21 : f32 to vector<8x128xf32>
    %28 = arith.mulf %27, %26 : vector<8x128xf32>
    %29 = vector.broadcast %22 : f32 to vector<8x128xf32>
    %30 = arith.addf %28, %29 : vector<8x128xf32>
    %31 = arith.truncf %30 : vector<8x128xf32> to vector<8x128xbf16>
    %c0_10 = arith.constant 0 : index
    %c0_11 = arith.constant 0 : index
    %32 = vector.load %arg3[%c0_10, %c0_11] : memref<128x128xbf16, #tpu.memory_space<vmem>>, vector<128x128xbf16>
    %cst_12 = arith.constant dense<0.000000e+00> : vector<8x128xf32>
    %33 = tpu.matmul %31, %32, %cst_12 {dimension_numbers = #tpu.dot_dimension_numbers<[1], [0], [0], [1], [0, 0, 1, 1], [], []>} : vector<8x128xbf16>, vector<128x128xbf16>, vector<8x128xf32> -> vector<8x128xf32>
    %c0_13 = arith.constant 0 : index
    %c0_14 = arith.constant 0 : index
    %34 = vector.load %arg4[%c0_13, %c0_14] : memref<1x128xf32, #tpu.memory_space<vmem>>, vector<1x128xf32>
    %35 = vector.broadcast %34 : vector<1x128xf32> to vector<8x128xf32>
    %36 = arith.addf %33, %35 : vector<8x128xf32>
    %c0_15 = arith.constant 0 : index
    %c0_16 = arith.constant 0 : index
    %37 = vector.load %arg2[%c0_15, %c0_16] : memref<8x128xf32, #tpu.memory_space<vmem>>, vector<8x128xf32>
    %38 = arith.addf %37, %36 : vector<8x128xf32>
    %c0_17 = arith.constant 0 : index
    %c0_18 = arith.constant 0 : index
    %39 = vector.load %arg7[%c0_17, %c0_18] : memref<8x128xf32, #tpu.memory_space<vmem>>, vector<8x128xf32>
    tpu.vector_store %arg7[%c0_17, %c0_18], %38 {strides = array<i32>} : memref<8x128xf32, #tpu.memory_space<vmem>>, vector<8x128xf32>,
    return
  }
  func.func @transform_0(%arg0: i32, %arg1: memref<1xi32, #tpu.memory_space<smem>>) -> (i32, i32) {
    %c0_i32 = arith.constant 0 : i32
    %c0_i32_0 = arith.constant 0 : i32
    return %arg0, %c0_i32 : i32, i32
  }
  func.func @transform_1(%arg0: i32, %arg1: memref<1xi32, #tpu.memory_space<smem>>) -> (i32, i32) {
    %c0_i32 = arith.constant 0 : i32
    %c0_i32_0 = arith.constant 0 : i32
    %c0_i32_1 = arith.constant 0 : i32
    return %c0_i32, %c0_i32_0 : i32, i32
  }
  func.func @transform_2(%arg0: i32, %arg1: memref<1xi32, #tpu.memory_space<smem>>) -> (i32, i32) {
    %c0_i32 = arith.constant 0 : i32
    %c0_i32_0 = arith.constant 0 : i32
    %c0_i32_1 = arith.constant 0 : i32
    return %c0_i32, %c0_i32_0 : i32, i32
  }
  func.func @transform_3(%arg0: i32, %arg1: memref<1xi32, #tpu.memory_space<smem>>) -> i32 {
    %c0_i32 = arith.constant 0 : i32
    %c0_i32_0 = arith.constant 0 : i32
    return %c0_i32 : i32
  }
  func.func @transform_4(%arg0: i32, %arg1: memref<1xi32, #tpu.memory_space<smem>>) -> i32 {
    %c0_i32 = arith.constant 0 : i32
    %c0_i32_0 = arith.constant 0 : i32
    return %c0_i32 : i32
  }
  func.func @transform_5(%arg0: i32, %arg1: memref<1xi32, #tpu.memory_space<smem>>) -> (i32, i32) {
    %c0_i32 = arith.constant 0 : i32
    %c0_i32_0 = arith.constant 0 : i32
    return %arg0, %c0_i32 : i32, i32
  }
}

</mosaic_0001>

<bundles_post_ra>
// kernel: tpu_custom_call.1
= control target key start
LH: loop header
LB: loop body
LE: loop exit
PB: predicated region body
PF: predicated region fallthrough
CT: control target
= control target key end

     0   :  { %s1011_s0 = inlined_call_operand.<no memory space> [shape: s32[1], index: 0, kind: input, shape index: {}]   ;;  %s1012_s1 = inlined_call_operand.hbm [shape: f32[16,128], index: 1, kind: input, shape index: {}]   ;;  %s1013_s2 = inlined_call_operand.hbm [shape: bf16[128,128], index: 2, kind: input, shape index: {}]   ;;  %s1014_s3 = inlined_call_operand.vmem [shape: f32[1,128], index: 3, kind: input, shape index: {}]   ;;  %s1015_s4 = inlined_call_operand.<no memory space> [shape: f32[1], index: 4, kind: input, shape index: {}]   ;;  %s1016_s5 = inlined_call_operand.<no memory space> [shape: f32[1], index: 5, kind: input, shape index: {}]   ;;  %s1017_s6 = inlined_call_operand.hbm [shape: f32[16,128], index: 6, kind: output, shape index: {}]  }
   0x1   :  { %12 = sst [smem:[#allocation4]] %s1015_s4 }
   0x2   :  { %13 = sst [smem:[#allocation5]] %s1016_s5 }
   0x3   :  { %14 = vsyncpa [#allocation7], 0 }
   0x4   :  { %16 = vsyncpa [#allocation7 + $0x1], 0 }
   0x5   :  { %17 = vsyncpa [#allocation10], 0 }
   0x6   :  { %18 = vsyncpa [#allocation8], 0 }
   0x7   :  { %20 = vsyncpa [#allocation8 + $0x1], 0  ;;  %s801_s24 = smov 0   ;;  %s803_s25 = smov 0  }
   0x8   :  { %s805_s26 = smov 0   ;;  %s807_s27 = smov 0  }
   0x9 LB: > { %s822_s4 = sadd.s32 4294967295, %s751_s27   ;;  %s498_s5 = sadd.s32 4294967294, %s751_s27   ;;  %s751_s27 = sphi %s807_s27, %s1037_s27   ;;  %s747_s26 = sphi %s805_s26, %s1036_s26   ;;  %s743_s25 = sphi %s803_s25, %s1035_s25   ;;  %s739_s24 = sphi %s801_s24, %s1034_s24  }
   0xa   : > { %p46_p0 = scmp.ne.s32.totalorder %s743_s25, %s739_s24  ;;  %p1018_p1 = scmp.eq.s32.totalorder %s822_s4, 0 }
   0xb   : > { %p160_p3 = scmp.eq.s32.totalorder %s498_s5, 1  ;;  %p499_p5 = scmp.ge.s32.totalorder %s751_s27, 1 }
   0xc   : > { %p831_p4 = por %p1018_p1, %p46_p0  ;;  %p167_p7 = scmp.lt.s32.totalorder %s751_s27, 3 }
   0xd   : > { %p836_p6 = por %p160_p3, %p46_p0  ;;  %s753_s7 = smov [#allocation9]  }
   0xe   : > { %s1021_s28 = scalar_select %p831_p4, 1, 0 }
   0xf   : > { %s1022_s29 = scalar_select %p836_p6, 1, 0 }
  0x10   : > { %p841_p8 = pnand %p499_p5, %p167_p7  ;;  %s179_s8 = sshll.u32 %s753_s7, 4  ;;  %s845_s8 = int_to_ptr.vmem [resolvable:$true] %s179_s8 }
  0x11   : > { %s857_s10 = sadd.s32 1, %s751_s27   ;;  %s33_s11 = sadd.s32 1, %s747_s26 }
  0x12   : > { %s1023_s30 = scalar_select %p841_p8, 1, 0 }
  0x13   : > { %p558_p9 = pneg %p841_p8  ;;  %s30_s12 = ssub.s32 %s751_s27, %s857_s10 }
  0x14   : > { %s623_s15 = scalar_lea.hbm %s1013_s2, 1024 }
  0x15   : > { %p852_p11 = pnand %p558_p9, %p1018_p1  ;;  %p624_p12 = scmp.ne.s32.totalorder %s1013_s2, %s623_s15 }
  0x16   : > { %p630_p5 = scmp.lt.u32.totalorder %s623_s15, %s1013_s2 }
  0x17   : > { %p625_p13 = pneg %p852_p11 }
  0x19   : > { %p626_p0 = pnand %p625_p13, %p624_p12 }
  0x1b   : > { %p627_p3 = pneg %p626_p0 }
  0x1d   : > { %p632_p7 = pnand %p630_p5, %p627_p3 }
  0x1f   : > { %635 = shalt.err (!%p632_p7)
}
  0x20   : > { %s636_s20 = scalar_lea.vmem %s845_s8, 1024  ;;  %p644_p2 = scmp.lt.s32.totalorder %s845_s8, %s845_s8 }
  0x21   : > { %p637_p9 = scmp.ne.s32.totalorder %s845_s8, %s636_s20  ;;  %p645_p6 = scmp.lt.s32.totalorder %s636_s20, %s636_s20 }
  0x23   : > { %p639_p10 = pnand %p637_p9, %p625_p13  ;;  %p646_p4 = por %p645_p6, %p644_p2 }
  0x25   : > { %p640_p1 = pneg %p639_p10 }
  0x27   : > { %p647_p8 = pnand %p646_p4, %p640_p1 }
  0x29   : > { %650 = shalt.err (!%p647_p8)
}
  0x2a   : > { %s754_s21 = smov 64   ;;  %s755_s0 = smov 4  }
  0x2b   : > { %561 = dma.hbm_to_vmem [thread:$0]  (!%p852_p11), %s1013_s2, 1024, %s845_s8, [#allocation10], %s754_s21, %s754_s21, %s755_s0  }
  0x2c   : > { %p31_p2 = scmp.eq.s32.totalorder %s30_s12, 0  ;;  %p40_p1 = scmp.ne.s32.totalorder %s747_s26, %s743_s25 }
  0x2d   : > { %p41_p4 = scmp.eq.s32.totalorder %s751_s27, 0  ;;  %p571_p6 = scmp.lt.s32.totalorder %s751_s27, 2 }
  0x2e   : > { %s888_s5 = scalar_select %p31_p2, %s747_s26, %s33_s11  }
  0x2f   : > { %p42_p8 = por %p41_p4, %p40_p1  ;;  %p1025_p10 = scmp.eq.s32.totalorder %s822_s4, 1 }
  0x30   : > { %s202_s13 = sand.u32 1, %s747_s26   ;;  %s503_s14 = sshll.u32 %s751_s27, 7 }
  0x31   : > { %p892_p12 = por %p1025_p10, %p40_p1  ;;  %s502_s15 = sshll.u32 %s202_s13, 3 }
  0x32   : > { %s901_s17 = scalar_lea.hbm %s1012_s1, %s503_s14  ;;  %s206_s8 = scalar_lea.vmem [#allocation6], %s502_s15 }
  0x33   : > { %s213_s11 = sshll.u32 %s206_s8, 4  ;;  %p903_p11 = pnand %p571_p6, %p42_p8  ;;  %s907_s11 = int_to_ptr.vmem [resolvable:$true] %s213_s11 }
  0x34   : > { %s203_s18 = scalar_lea.sflag [#allocation7], %s202_s13  ;;  %s651_s19 = scalar_lea.hbm %s901_s17, 128 }
  0x35   : > { %p652_p13 = scmp.ne.s32.totalorder %s901_s17, %s651_s19  ;;  %p653_p0 = pneg %p903_p11 }
  0x36   : > { %s656_s0 = scalar_lea.hbm %s1012_s1, 256  ;;  %p657_p7 = scmp.lt.u32.totalorder %s901_s17, %s1012_s1 }
  0x37   : > { %p654_p3 = pnand %p653_p0, %p652_p13  ;;  %p658_p9 = scmp.lt.u32.totalorder %s656_s0, %s651_s19 }
  0x38   : > { %p660_p1 = scmp.lt.u32.totalorder %s651_s19, %s901_s17 }
  0x39   : > { %p655_p5 = pneg %p654_p3  ;;  %p659_p2 = por %p658_p9, %p657_p7 }
  0x3b   : > { %p661_p4 = por %p660_p1, %p659_p2 }
  0x3d   : > { %p662_p6 = pnand %p661_p4, %p655_p5 }
  0x3f   : > { %665 = shalt.err (!%p662_p6)
}
  0x40   : > { %s666_s13 = scalar_lea.vmem %s907_s11, 128  ;;  %s756_s14 = smov [#allocation6]  }
  0x41   : > { %p667_p8 = scmp.ne.s32.totalorder %s907_s11, %s666_s13  ;;  %s671_s15 = sshll.u32 %s756_s14, 4  ;;  %s672_s15 = int_to_ptr.vmem [resolvable:$false] %s671_s15 }
  0x42   : > { %s673_s9 = scalar_lea.vmem %s672_s15, 256  ;;  %p674_p3 = scmp.lt.s32.totalorder %s907_s11, %s672_s15 }
  0x43   : > { %p669_p10 = pnand %p667_p8, %p653_p0  ;;  %p675_p7 = scmp.lt.s32.totalorder %s673_s9, %s666_s13 }
  0x45   : > { %p670_p13 = pneg %p669_p10  ;;  %p676_p9 = por %p675_p7, %p674_p3 }
  0x47   : > { %p677_p2 = pnand %p676_p9, %p670_p13 }
  0x49   : > { %680 = shalt.err (!%p677_p2)
}
  0x4a   : > { %565 = dma.hbm_to_vmem [thread:$0]  (!%p903_p11), %s901_s17, 128, %s907_s11, %s203_s18  }
  0x4b   : > { %p1028_p5 = scmp.ne.s32.totalorder %s1023_s30, 0 }
  0x4c   : > { %s937_s16 = sand.u32 (!%p1028_p5), 1, %s743_s25   ;;  %p1029_p0 = scmp.ne.s32.totalorder (!%p1028_p5), %s1021_s28, 0 }
  0x4d   : > { %222 = sbr.rel (%p1028_p5) target bundleno = 509 (0x1fd), region = 40  ;;  %s505_s8 = sshll.u32 (!%p1028_p5), %s937_s16, 3 }
  0x4e   : > { %s225_s19 = scalar_lea.sflag (!%p1028_p5), [#allocation7], %s937_s16  ;;  %s228_s20 = scalar_lea.vmem (!%p1028_p5), [#allocation6], %s505_s8 }
  0x54   : > { %726 = dma.done.wait (%p1029_p0), %s225_s19, 128  }
  0x55   : > { %728 = vsyncadd (%p1029_p0), %s225_s19, 4294967168  ;;  %p1030_p11 = scmp.eq.s32.totalorder %s822_s4, 0 }
  0x57   : > { %730 = dma.done.wait (%p1030_p11), [#allocation10], 1024   ;;  %p1031_p1 = pmov %p1030_p11 }
  0x58   : > { %v951_v0 = vld [vmem:[%s228_s20] sm:$0xff]  ;;  %v611_v2 = vld [vmem:[#allocation9] sm:$0xff]   ;;  %v757_v3 = vmov 0.0   ;;  %v612_v4 = vld [vmem:[#allocation9 + $0x8] sm:$0xff]   ;;  %vm758_vm0 = vmmov 0   ;;  %s282_s28 = sld [smem:[#allocation4]] }
  0x59   : > { %732 = vsyncadd (%p1031_p1), [#allocation10], 4294966272  ;;  %261 = vadd.xlane.f32.xlu0 %v951_v0  ;;  %v263_v1 = vmul.f32 %v951_v0, %v951_v0  ;;  %530 = vmatprep.subr.bf16.mxu0 %v757_v3  ;;  %v613_v5 = vld [vmem:[#allocation9 + $0x10] sm:$0xff]   ;;  %v614_v6 = vld [vmem:[#allocation9 + $0x18] sm:$0xff]   ;;  %s283_s30 = sld [smem:[#allocation5]]  ;;  %s518_s12 = sshll.u32 %s822_s4, 7 }
  0x5a   : > { %531 = vmatpush3.bf16.msra.mxu0 %v611_v2  ;;  %546 = vmatprep.mubr.msk.bf16.mxu0 %vm758_vm0, %v757_v3  ;;  %v615_v7 = vld [vmem:[#allocation9 + $0x20] sm:$0xff]   ;;  %v616_v8 = vld [vmem:[#allocation9 + $0x28] sm:$0xff]   ;;  %v617_v9 = vld [vmem:[#allocation9 + $0x30] sm:$0xff]   ;;  %s258_s18 = scalar_lea.vmem [#allocation11], %s505_s8  ;;  %s967_s23 = scalar_lea.hbm %s1017_s6, %s518_s12 }
  0x5b   : > { %532 = vmatprep.subr.bf16.mxu0 %v757_v3  ;;  %v618_v10 = vld [vmem:[#allocation9 + $0x38] sm:$0xff]   ;;  %v508_v33 = vld [vmem:[%s1014_s3] ss:$0 sm:$0xff]  ;;  %s418_s21 = sshll.u32 %s258_s18, 4  ;;  %s405_s4 = scalar_lea.sflag [#allocation8], %s937_s16  ;;  %s969_s21 = int_to_ptr.vmem [resolvable:$true] %s418_s21 }
  0x5c   : > { %s681_s13 = scalar_lea.vmem %s969_s21, 128  ;;  %s759_s14 = smov [#allocation11]  }
  0x5d   : > { %264 = vadd.xlane.f32.xlu0 %v263_v1  ;;  %p682_p4 = scmp.ne.s32.totalorder %s969_s21, %s681_s13  ;;  %s685_s15 = sshll.u32 %s759_s14, 4  ;;  %s686_s15 = int_to_ptr.vmem [resolvable:$false] %s685_s15 }
  0x5e   : > { %533 = vmatpush3.bf16.msra.mxu0 %v612_v4  ;;  %v286_v27 = vstv %s282_s28  ;;  %s687_s9 = scalar_lea.vmem %s686_s15, 256  ;;  %p688_p10 = scmp.lt.s32.totalorder %s969_s21, %s686_s15 }
  0x5f   : > { %534 = vmatprep.subr.bf16.mxu0 %v757_v3  ;;  %v288_v29 = vstv %s283_s30  ;;  %p683_p6 = pnand %p682_p4, %p892_p12  ;;  %p689_p13 = scmp.lt.s32.totalorder %s687_s9, %s681_s13 }
  0x61   : > { %p684_p8 = pneg %p683_p6  ;;  %p690_p3 = por %p689_p13, %p688_p10 }
  0x62   : > { %535 = vmatpush3.bf16.msra.mxu0 %v613_v5 }
  0x63   : > { %536 = vmatprep.subr.bf16.mxu0 %v757_v3  ;;  %p691_p7 = pnand %p690_p3, %p684_p8 }
  0x66   : > { %537 = vmatpush3.bf16.msra.mxu0 %v614_v6 }
  0x67   : > { %538 = vmatprep.subr.bf16.mxu0 %v757_v3 }
  0x6a   : > { %539 = vmatpush3.bf16.msra.mxu0 %v615_v7 }
  0x6b   : > { %540 = vmatprep.subr.bf16.mxu0 %v757_v3 }
  0x6e   : > { %541 = vmatpush3.bf16.msra.mxu0 %v616_v8 }
  0x6f   : > { %542 = vmatprep.subr.bf16.mxu0 %v757_v3 }
  0x72   : > { %543 = vmatpush3.bf16.msra.mxu0 %v617_v9 }
  0x73   : > { %544 = vmatprep.subr.bf16.mxu0 %v757_v3 }
  0x76   : > { %545 = vmatpush3.bf16.msra.mxu0 %v618_v10 }
  0xe6   : > { %v262_v11 = vpop.xlane.xlu0 %261 }
  0xe7   : > { %v266_v12 = vmul.f32 0.0078125, %v262_v11 }
  0xe9   : > { %v267_v13 = vmul.f32 128.0, %v266_v12  ;;  %v284_v25 = vsub.f32 %v951_v0, %v266_v12 }
  0xea   : > { %v265_v14 = vpop.xlane.xlu0 %264 }
  0xeb   : > { %v268_v15 = vmul.f32 %v267_v13, %v266_v12 }
  0xed   : > { %v269_v16 = vsub.f32 %v265_v14, %v268_v15 }
  0xef   : > { %v270_v17 = vmul.f32 0.007874016, %v269_v16 }
  0xf1   : > { %v271_v18 = vmax.f32 %v270_v17, 0.0 }
  0xf3   : > { %619 = vrsqrt.f32 %v271_v18  ;;  %vm274_vm1 = vcmp.eq.f32.partialorder %v271_v18, inf  ;;  %v277_v21 = vand.u32 2147483648, %v271_v18  ;;  %vm276_vm2 = vcmp.eq.f32.partialorder %v271_v18, 0.0 }
  0xfd   : > { %v620_v19 = vpop.eup %619 }
  0xfe   : > { %v273_v20 = vmul.f32 %v620_v19, %v271_v18 }
 0x100   : > { %v275_v22 = vsel %vm274_vm1, %v271_v18, %v273_v20 }
 0x101   : > { %v278_v23 = vsel %vm276_vm2, %v277_v21, %v275_v22 }
 0x102   : > { %v279_v24 = vadd.f32 1e-06, %v278_v23 }
 0x104   : > { %621 = vrcp.f32 %v279_v24 }
 0x10e   : > { %v622_v26 = vpop.eup %621 }
 0x10f   : > { %v285_v28 = vmul.f32 %v622_v26, %v284_v25 }
 0x111   : > { %v287_v30 = vmul.f32 %v286_v27, %v285_v28 }
 0x113   : > { %v289_v31 = vadd.f32 %v288_v29, %v287_v30 }
 0x115   : > { %v290_v32 = vpack.c.bf16 %v289_v31, %v289_v31 }
 0x117   : > { %547 = vmatmul.mubr.bf16.vlgmr.msra.gmra.mrb[0].mxu0 %v290_v32 }
 0x1ea   : > { %v396_v34 = vpop.f32.mrb[0].mxu0 }
 0x1eb   : > { %v397_v35 = vadd.f32 %v508_v33, %v396_v34  ;;  %v548_v36 = vpop.f32.mrb[1].mxu0 }
 0x1ec   : > { %v399_v37 = vpop.f32.mrb[2].mxu0 }
 0x1ed   : > { %v402_v38 = vadd.f32 %v397_v35, %v951_v0  ;;  %v549_v39 = vpop.f32.mrb[3].mxu0 }
 0x1ef   : > { %403 = vst [vmem:[%s258_s18] sm:$0xff] %v402_v38 }
 0x1f0   : > { %694 = shalt.err (!%p691_p7)
}
 0x1f1   : > { %s695_s16 = scalar_lea.hbm %s967_s23, 128  ;;  %s699_s20 = scalar_lea.hbm %s1017_s6, 256 }
 0x1f2   : > { %p696_p9 = scmp.ne.s32.totalorder %s967_s23, %s695_s16  ;;  %p700_p0 = scmp.lt.u32.totalorder %s967_s23, %s1017_s6 }
 0x1f3   : > { %p701_p11 = scmp.lt.u32.totalorder %s699_s20, %s695_s16  ;;  %p703_p4 = scmp.lt.u32.totalorder %s695_s16, %s967_s23 }
 0x1f4   : > { %p697_p2 = pnand %p696_p9, %p892_p12 }
 0x1f5   : > { %p702_p1 = por %p701_p11, %p700_p0 }
 0x1f6   : > { %p698_p5 = pneg %p697_p2 }
 0x1f7   : > { %p704_p6 = por %p703_p4, %p702_p1 }
 0x1f9   : > { %p705_p8 = pnand %p704_p6, %p698_p5 }
 0x1fb   : > { %708 = shalt.err (!%p705_p8)
}
 0x1fc   : > { %556 = dma.vmem_to_hbm [thread:$0]  (%p892_p12), %s969_s21, 128, %s967_s23, %s405_s4  }
 0x1fd PF: > { %s430_s17 = sand.u32 1, %s739_s24   ;;  %p1032_p10 = scmp.ne.s32.totalorder %s1022_s29, 0 }
 0x1fe   : > { %p1033_p13 = scmp.ge.s32.totalorder %s751_s27, 2  ;;  %s431_s11 = scalar_lea.sflag [#allocation8], %s430_s17 }
 0x200   : > { %p567_p3 = pnand %p1033_p13, %p1032_p10 }
 0x202   : > { %734 = dma.done.wait (!%p567_p3), %s431_s11, 128  }
 0x203   : > { %736 = vsyncadd (!%p567_p3), %s431_s11, 4294967168  ;;  %p23_p7 = scmp.ge.s32.totalorder %s857_s10, 4   ;;  %s1034_s24 = smov %s743_s25 }
 0x204   : > { %s1035_s25 = smov %s747_s26  ;;  %s1036_s26 = smov %s888_s5 }
 0x205   : > { %s1037_s27 = smov %s857_s10  ;;  %25 = sbr.rel (!%p23_p7) target bundleno = 9 (0x9), region = 89 }
 0x20c   :  { %436 = vsyncpa [#allocation7], 1 }
 0x20d   :  { %438 = vsyncpa [#allocation7 + $0x1], 1 }
 0x20e   :  { %439 = vsyncpa [#allocation10], 1 }
 0x20f   :  { %440 = vsyncpa [#allocation8], 1 }
 0x210   :  { %442 = vsyncpa [#allocation8 + $0x1], 1 }

</bundles_post_ra>
